<compile_context>
chip_gen: v5e
topology: v5e:2x2
jax: 0.10.0
libtpu: 0.0.40
codegen_flags: <defaults>
</compile_context>

<pallas_src>
import numpy as np
import jax
import jax.numpy as jnp
from jax.experimental import pallas as pl
from jax.experimental.pallas import tpu as pltpu

# ---- Module configuration:
#      Attention2d(in_channels=4, out_channels=8, num_kernels=2,
#                  kernel_size=(3,3), padding_size=(1,1)),
#      called with x of shape [2,4,16,16] and size=(8,8). ----
N = 2          # batch
C = 4          # in_channels
K = 2          # num_kernels
OC = 8         # out_channels
CK = C * K     # conv_depth output channels
H = W = 16     # input spatial
OH = OW = 8    # adaptive_max_pool2d target size (H/OH == W/OW == 2 exactly)
KH = KW = 3    # conv_depth kernel
PH = PW = 1    # conv_depth padding
EPS = 1e-5     # BatchNorm2d eps

P = OH * OW            # 64  pooled spatial positions per image
NP = N * P             # 128 lanes: batch packed along lanes -> lane-dense everywhere
CP = 8                 # channels padded to one full sublane tile
NTAPS = KH * KW        # 9
WT_ROW0 = NTAPS * CP   # 72: first row of the weight/affine block inside params
PAR_ROWS = WT_ROW0 + CP  # 80 rows total in the packed params slab
GCOL = NTAPS * CP      # 72: gamma column inside the weight/affine block
BCOL = GCOL + 1        # 73: beta column


def _attention2d_kernel(x4_ref, par_ref, o_ref):
    # x4_ref : [4, CP, NP]   the four 2x2-pool phase planes; rows = padded channels,
    #                        lanes = (n, oh, ow) packed (batch along lanes)
    # par_ref: [PAR_ROWS, NP] rows 0..71 : per-tap validity masks, sublane-replicated
    #                         rows 72..79: cols 0..71 fused conv weights [OC, 9*CP],
    #                                      col 72 = gamma, col 73 = beta
    # o_ref  : [OC, NP]      sigmoid(bn(conv(pool(x)))) as [OC, N*OH*OW] (lane dense)

    # ---- adaptive_max_pool2d(x, (8,8)) == non-overlapping 2x2 max pool ----
    # Phases were pre-binned by the wrapper -> pooling is 3 elementwise maximums (VPU).
    pooled = jnp.maximum(jnp.maximum(x4_ref[0], x4_ref[1]),
                         jnp.maximum(x4_ref[2], x4_ref[3]))          # [CP, NP]

    # ---- folded conv_depth (grouped 3x3) + conv_point (1x1): ONE K=72 MXU matmul ----
    # patch row t*CP + c = mask_t * pooled[c, lane + d_t]; valid taps never cross an
    # image's 64-lane block, so a circular lane roll + precomputed mask is exact.
    chunks = []
    for t in range(NTAPS):
        du, dv = t // KW - PH, t % KW - PW
        d = du * OW + dv
        if d == 0:
            chunks.append(pooled)                                    # center tap: all valid
        else:
            shifted = pltpu.roll(pooled, shift=(-d) % NP, axis=1)    # out[q] = pooled[q + d]
            chunks.append(par_ref[t * CP:(t + 1) * CP, :] * shifted)
    patch = jnp.concatenate(chunks, axis=0)                          # [72, NP] (8-row aligned)
    wt = par_ref[WT_ROW0:WT_ROW0 + OC, 0:NTAPS * CP]                 # [OC, 72]
    z = jnp.dot(wt, patch, preferred_element_type=jnp.float32)       # [OC, NP]

    # ---- BatchNorm2d, training mode: biased batch stats over (n, oh, ow) = 128 lanes ----
    mean = jnp.sum(z, axis=1, keepdims=True) * (1.0 / NP)
    zc = z - mean
    var = jnp.sum(zc * zc, axis=1, keepdims=True) * (1.0 / NP)
    gamma = par_ref[WT_ROW0:WT_ROW0 + OC, GCOL:GCOL + 1]             # [OC, 1]
    beta = par_ref[WT_ROW0:WT_ROW0 + OC, BCOL:BCOL + 1]              # [OC, 1]
    zn = zc * (gamma * jax.lax.rsqrt(var + EPS)) + beta

    # ---- sigmoid (tanh form: numerically stable, runs on the EUP) ----
    o_ref[...] = 0.5 * jnp.tanh(0.5 * zn) + 0.5


def prepare_params(wd, bd, wp, bp, gamma, beta):
    """One-time (host-side) fold of the PyTorch-shaped parameters into ONE packed slab.

    conv_depth (grouped 3x3) followed by conv_point (1x1) is a composition of linear
    maps, so it equals one 3x3 conv with
        Weff[u, v, oc, c] = sum_k wp[oc, c*K + k] * wd[c*K + k, 0, u, v].
    The conv biases bd/bp only add a per-output-channel constant, which training-mode
    BatchNorm's batch-mean subtraction cancels exactly -> dropped (the full reference
    below keeps them and validates this).
    Slab layout ([PAR_ROWS, NP] f32):
      rows 0..71 : per-tap validity mask, tiled over the batch and replicated over the
                   8 sublanes of each tap chunk (so the kernel needs no broadcasts)
      rows 72..79: cols 0..71 = fused weights wt[oc, t*CP + c]; col 72 = gamma; col 73 = beta
    """
    del bd, bp  # exactly cancelled by the BN batch-mean subtraction
    wd = np.asarray(wd, np.float32).reshape(CK, KH, KW)
    wp = np.asarray(wp, np.float32).reshape(OC, CK)
    par = np.zeros((PAR_ROWS, NP), np.float32)
    for t in range(NTAPS):
        u, v = t // KW, t % KW
        du, dv = u - PH, v - PW
        # validity mask for this tap (same for every image in the batch)
        m = np.zeros((P,), np.float32)
        for i in range(OH):
            for j in range(OW):
                if 0 <= i + du < OH and 0 <= j + dv < OW:
                    m[i * OW + j] = 1.0
        par[t * CP:(t + 1) * CP, :] = np.tile(m, N)[None, :]
        # fused depthwise+pointwise weight for this tap
        weff = np.zeros((OC, C), np.float32)
        for c in range(C):
            for k in range(K):
                weff[:, c] += wp[:, c * K + k] * wd[c * K + k, u, v]
        par[WT_ROW0:WT_ROW0 + OC, t * CP:t * CP + C] = weff
    par[WT_ROW0:WT_ROW0 + OC, GCOL] = np.asarray(gamma, np.float32)
    par[WT_ROW0:WT_ROW0 + OC, BCOL] = np.asarray(beta, np.float32)
    return jnp.asarray(par)


@jax.jit
def attention2d_forward(x, params):
    """x: [N, C, H, W] float32 (NCHW).  Returns [N, OC, OH, OW] (NCHW), float32."""
    # 8 KiB wrapper transpose: pre-bin the four 2x2-pool phases and pack the batch
    # along lanes -> kernel input [4, CP, NP] with lane index = n*P + oh*OW + ow.
    x4 = x.reshape(N, C, OH, 2, OW, 2).transpose(3, 5, 1, 0, 2, 4).reshape(4, C, NP)
    x4 = jnp.pad(x4, ((0, 0), (0, CP - C), (0, 0)))
    out = pl.pallas_call(
        _attention2d_kernel,
        out_shape=jax.ShapeDtypeStruct((OC, NP), jnp.float32),
        in_specs=[
            pl.BlockSpec((4, CP, NP), lambda: (0, 0, 0)),
            pl.BlockSpec((PAR_ROWS, NP), lambda: (0, 0)),
        ],
        out_specs=pl.BlockSpec((OC, NP), lambda: (0, 0)),
    )(x4, params)
    # lane-dense [OC, N*OH*OW] back to NCHW
    return out.reshape(OC, N, OH, OW).transpose(1, 0, 2, 3)


def reference_forward(x, wd, bd, wp, bp, gamma, beta):
    """Pure-JAX reference with full PyTorch semantics (keeps the conv biases)."""
    rows = []
    for i in range(OH):
        hs = (i * H) // OH
        he = -(-((i + 1) * H) // OH)
        cols = []
        for j in range(OW):
            ws = (j * W) // OW
            we = -(-((j + 1) * W) // OW)
            cols.append(jnp.max(x[:, :, hs:he, ws:we], axis=(2, 3)))
        rows.append(jnp.stack(cols, axis=-1))
    pooled = jnp.stack(rows, axis=-2)                        # [N, C, OH, OW]
    y = jax.lax.conv_general_dilated(
        pooled, wd, (1, 1), ((PH, PH), (PW, PW)),
        dimension_numbers=('NCHW', 'OIHW', 'NCHW'), feature_group_count=C)
    y = y + bd.reshape(1, CK, 1, 1)
    z = jax.lax.conv_general_dilated(
        y, wp, (1, 1), 'VALID', dimension_numbers=('NCHW', 'OIHW', 'NCHW'))
    z = z + bp.reshape(1, OC, 1, 1)
    mean = jnp.mean(z, axis=(0, 2, 3), keepdims=True)
    var = jnp.mean(jnp.square(z - mean), axis=(0, 2, 3), keepdims=True)
    z_hat = (z - mean) / jnp.sqrt(var + EPS)
    return jax.nn.sigmoid(
        gamma.reshape(1, OC, 1, 1) * z_hat + beta.reshape(1, OC, 1, 1))


if __name__ == "__main__":
    key = jax.random.PRNGKey(0)
    k1, k2, k3, k4, k5, k6, k7 = jax.random.split(key, 7)

    # Deterministic synthetic tensors in the PyTorch parameter shapes.
    x = jax.random.normal(k1, (N, C, H, W), jnp.float32)
    wd = 0.2 * jax.random.normal(k2, (CK, 1, KH, KW), jnp.float32)   # conv_depth.weight
    bd = 0.1 * jax.random.normal(k3, (CK,), jnp.float32)             # conv_depth.bias
    wp = 0.2 * jax.random.normal(k4, (OC, CK, 1, 1), jnp.float32)    # conv_point.weight
    bp = 0.1 * jax.random.normal(k5, (OC,), jnp.float32)             # conv_point.bias
    gamma = 1.0 + 0.1 * jax.random.normal(k6, (OC,), jnp.float32)    # bn.weight
    beta = 0.05 * jax.random.normal(k7, (OC,), jnp.float32)          # bn.bias
    # TODO(synk): BatchNorm running_mean/running_var updates are a training-mode state
    # side effect; they do not affect the returned tensor and are skipped.

    params = prepare_params(wd, bd, wp, bp, gamma, beta)

    out = attention2d_forward(x, params)
    out = jax.block_until_ready(out)

    ref = reference_forward(x, wd, bd, wp, bp, gamma, beta)
    assert out.shape == (N, OC, OH, OW), out.shape
    np.testing.assert_allclose(np.asarray(out), np.asarray(ref),
                               rtol=2e-4, atol=2e-4)
    print("KERNEL_OK")
</pallas_src>

<mosaic_0001>
module attributes {stable_mosaic.version = 11 : i64} {
  func.func @_attention2d_kernel(%arg0: memref<4x8x128xf32, #tpu.memory_space<vmem>>, %arg1: memref<80x128xf32, #tpu.memory_space<vmem>>, %arg2: memref<8x128xf32, #tpu.memory_space<vmem>>) attributes {dimension_semantics = [], scalar_prefetch = 0 : i64, scratch_operands = 0 : i64, tpu.core_type = #tpu.core_type<tc>} {
    %c0 = arith.constant 0 : index
    %c0_0 = arith.constant 0 : index
    %c0_1 = arith.constant 0 : index
    %0 = vector.load %arg0[%c0, %c0_0, %c0_1] : memref<4x8x128xf32, #tpu.memory_space<vmem>>, vector<1x8x128xf32>
    %1 = vector.shape_cast %0 : vector<1x8x128xf32> to vector<8x128xf32>
    %c1 = arith.constant 1 : index
    %c0_2 = arith.constant 0 : index
    %c0_3 = arith.constant 0 : index
    %2 = vector.load %arg0[%c1, %c0_2, %c0_3] : memref<4x8x128xf32, #tpu.memory_space<vmem>>, vector<1x8x128xf32>
    %3 = vector.shape_cast %2 : vector<1x8x128xf32> to vector<8x128xf32>
    %4 = arith.maximumf %1, %3 : vector<8x128xf32>
    %c2 = arith.constant 2 : index
    %c0_4 = arith.constant 0 : index
    %c0_5 = arith.constant 0 : index
    %5 = vector.load %arg0[%c2, %c0_4, %c0_5] : memref<4x8x128xf32, #tpu.memory_space<vmem>>, vector<1x8x128xf32>
    %6 = vector.shape_cast %5 : vector<1x8x128xf32> to vector<8x128xf32>
    %c3 = arith.constant 3 : index
    %c0_6 = arith.constant 0 : index
    %c0_7 = arith.constant 0 : index
    %7 = vector.load %arg0[%c3, %c0_6, %c0_7] : memref<4x8x128xf32, #tpu.memory_space<vmem>>, vector<1x8x128xf32>
    %8 = vector.shape_cast %7 : vector<1x8x128xf32> to vector<8x128xf32>
    %9 = arith.maximumf %6, %8 : vector<8x128xf32>
    %10 = arith.maximumf %4, %9 : vector<8x128xf32>
    %c9_i32 = arith.constant 9 : i32
    %11 = tpu.dynamic_rotate %10 by %c9_i32 dim 1 : vector<8x128xf32>, i32 -> vector<8x128xf32>
    %c0_8 = arith.constant 0 : index
    %c0_9 = arith.constant 0 : index
    %12 = vector.load %arg1[%c0_8, %c0_9] : memref<80x128xf32, #tpu.memory_space<vmem>>, vector<8x128xf32>
    %13 = arith.mulf %12, %11 : vector<8x128xf32>
    %c8_i32 = arith.constant 8 : i32
    %14 = tpu.dynamic_rotate %10 by %c8_i32 dim 1 : vector<8x128xf32>, i32 -> vector<8x128xf32>
    %c8 = arith.constant 8 : index
    %c0_10 = arith.constant 0 : index
    %15 = vector.load %arg1[%c8, %c0_10] : memref<80x128xf32, #tpu.memory_space<vmem>>, vector<8x128xf32>
    %16 = arith.mulf %15, %14 : vector<8x128xf32>
    %c7_i32 = arith.constant 7 : i32
    %17 = tpu.dynamic_rotate %10 by %c7_i32 dim 1 : vector<8x128xf32>, i32 -> vector<8x128xf32>
    %c16 = arith.constant 16 : index
    %c0_11 = arith.constant 0 : index
    %18 = vector.load %arg1[%c16, %c0_11] : memref<80x128xf32, #tpu.memory_space<vmem>>, vector<8x128xf32>
    %19 = arith.mulf %18, %17 : vector<8x128xf32>
    %c1_i32 = arith.constant 1 : i32
    %20 = tpu.dynamic_rotate %10 by %c1_i32 dim 1 : vector<8x128xf32>, i32 -> vector<8x128xf32>
    %c24 = arith.constant 24 : index
    %c0_12 = arith.constant 0 : index
    %21 = vector.load %arg1[%c24, %c0_12] : memref<80x128xf32, #tpu.memory_space<vmem>>, vector<8x128xf32>
    %22 = arith.mulf %21, %20 : vector<8x128xf32>
    %c127_i32 = arith.constant 127 : i32
    %23 = tpu.dynamic_rotate %10 by %c127_i32 dim 1 : vector<8x128xf32>, i32 -> vector<8x128xf32>
    %c40 = arith.constant 40 : index
    %c0_13 = arith.constant 0 : index
    %24 = vector.load %arg1[%c40, %c0_13] : memref<80x128xf32, #tpu.memory_space<vmem>>, vector<8x128xf32>
    %25 = arith.mulf %24, %23 : vector<8x128xf32>
    %c121_i32 = arith.constant 121 : i32
    %26 = tpu.dynamic_rotate %10 by %c121_i32 dim 1 : vector<8x128xf32>, i32 -> vector<8x128xf32>
    %c48 = arith.constant 48 : index
    %c0_14 = arith.constant 0 : index
    %27 = vector.load %arg1[%c48, %c0_14] : memref<80x128xf32, #tpu.memory_space<vmem>>, vector<8x128xf32>
    %28 = arith.mulf %27, %26 : vector<8x128xf32>
    %c120_i32 = arith.constant 120 : i32
    %29 = tpu.dynamic_rotate %10 by %c120_i32 dim 1 : vector<8x128xf32>, i32 -> vector<8x128xf32>
    %c56 = arith.constant 56 : index
    %c0_15 = arith.constant 0 : index
    %30 = vector.load %arg1[%c56, %c0_15] : memref<80x128xf32, #tpu.memory_space<vmem>>, vector<8x128xf32>
    %31 = arith.mulf %30, %29 : vector<8x128xf32>
    %c119_i32 = arith.constant 119 : i32
    %32 = tpu.dynamic_rotate %10 by %c119_i32 dim 1 : vector<8x128xf32>, i32 -> vector<8x128xf32>
    %c64 = arith.constant 64 : index
    %c0_16 = arith.constant 0 : index
    %33 = vector.load %arg1[%c64, %c0_16] : memref<80x128xf32, #tpu.memory_space<vmem>>, vector<8x128xf32>
    %34 = arith.mulf %33, %32 : vector<8x128xf32>
    %35 = tpu.concatenate %13, %16, %19, %22, %10, %25, %28, %31, %34 in 0 : vector<8x128xf32>, vector<8x128xf32>, vector<8x128xf32>, vector<8x128xf32>, vector<8x128xf32>, vector<8x128xf32>, vector<8x128xf32>, vector<8x128xf32>, vector<8x128xf32> -> vector<72x128xf32>
    %c72 = arith.constant 72 : index
    %c0_17 = arith.constant 0 : index
    %36 = vector.load %arg1[%c72, %c0_17] : memref<80x128xf32, #tpu.memory_space<vmem>>, vector<8x72xf32>
    %cst = arith.constant dense<0.000000e+00> : vector<8x128xf32>
    %37 = tpu.matmul %36, %35, %cst {dimension_numbers = #tpu.dot_dimension_numbers<[1], [0], [0], [1], [0, 0, 1, 1], [], []>} : vector<8x72xf32>, vector<72x128xf32>, vector<8x128xf32> -> vector<8x128xf32>
    %cst_18 = arith.constant dense<0.000000e+00> : vector<8xf32>
    %38 = vector.multi_reduction <add>, %37, %cst_18 [1] : vector<8x128xf32> to vector<8xf32>
    %39 = vector.shape_cast %38 : vector<8xf32> to vector<8x1xf32>
    %cst_19 = arith.constant 7.812500e-03 : f32
    %40 = vector.broadcast %cst_19 : f32 to vector<8x1xf32>
    %41 = arith.mulf %39, %40 : vector<8x1xf32>
    %42 = vector.broadcast %41 : vector<8x1xf32> to vector<8x128xf32>
    %43 = arith.subf %37, %42 : vector<8x128xf32>
    %44 = arith.mulf %43, %43 : vector<8x128xf32>
    %cst_20 = arith.constant dense<0.000000e+00> : vector<8xf32>
    %45 = vector.multi_reduction <add>, %44, %cst_20 [1] : vector<8x128xf32> to vector<8xf32>
    %46 = vector.shape_cast %45 : vector<8xf32> to vector<8x1xf32>
    %cst_21 = arith.constant 7.812500e-03 : f32
    %47 = vector.broadcast %cst_21 : f32 to vector<8x1xf32>
    %48 = arith.mulf %46, %47 : vector<8x1xf32>
    %c72_22 = arith.constant 72 : index
    %c72_23 = arith.constant 72 : index
    %49 = vector.load %arg1[%c72_22, %c72_23] : memref<80x128xf32, #tpu.memory_space<vmem>>, vector<8x1xf32>
    %c72_24 = arith.constant 72 : index
    %c73 = arith.constant 73 : index
    %50 = vector.load %arg1[%c72_24, %c73] : memref<80x128xf32, #tpu.memory_space<vmem>>, vector<8x1xf32>
    %cst_25 = arith.constant 9.99999974E-6 : f32
    %51 = vector.broadcast %cst_25 : f32 to vector<8x1xf32>
    %52 = arith.addf %48, %51 : vector<8x1xf32>
    %53 = math.rsqrt %52 : vector<8x1xf32>
    %54 = arith.mulf %49, %53 : vector<8x1xf32>
    %55 = vector.broadcast %54 : vector<8x1xf32> to vector<8x128xf32>
    %56 = arith.mulf %43, %55 : vector<8x128xf32>
    %57 = vector.broadcast %50 : vector<8x1xf32> to vector<8x128xf32>
    %58 = arith.addf %56, %57 : vector<8x128xf32>
    %cst_26 = arith.constant 5.000000e-01 : f32
    %59 = vector.broadcast %cst_26 : f32 to vector<8x128xf32>
    %60 = arith.mulf %59, %58 : vector<8x128xf32>
    %61 = math.tanh %60 : vector<8x128xf32>
    %cst_27 = arith.constant 5.000000e-01 : f32
    %62 = vector.broadcast %cst_27 : f32 to vector<8x128xf32>
    %63 = arith.mulf %62, %61 : vector<8x128xf32>
    %cst_28 = arith.constant 5.000000e-01 : f32
    %64 = vector.broadcast %cst_28 : f32 to vector<8x128xf32>
    %65 = arith.addf %63, %64 : vector<8x128xf32>
    %c0_29 = arith.constant 0 : index
    %c0_30 = arith.constant 0 : index
    %66 = vector.load %arg2[%c0_29, %c0_30] : memref<8x128xf32, #tpu.memory_space<vmem>>, vector<8x128xf32>
    tpu.vector_store %arg2[%c0_29, %c0_30], %65 {strides = array<i32>} : memref<8x128xf32, #tpu.memory_space<vmem>>, vector<8x128xf32>,
    return
  }
}

</mosaic_0001>

<bundles_post_ra>
// kernel: attention2d_forward.1
= control target key start
LH: loop header
LB: loop body
LE: loop exit
PB: predicated region body
PF: predicated region fallthrough
CT: control target
= control target key end

     0   :  { %s139_s17 = smov 119   ;;  %s140_s18 = smov 121   ;;  %vm54_vm0 = vcmask 588800   ;;  %v147_v37 = vmov 72   ;;  %v148_v38 = vmov 73   ;;  %s206_s0 = inlined_call_operand.vmem [shape: f32[4,8,128], index: 0, kind: input, shape index: {}]   ;;  %s207_s1 = inlined_call_operand.vmem [shape: f32[80,128], index: 1, kind: input, shape index: {}]   ;;  %s208_s2 = inlined_call_operand.vmem [shape: f32[8,128], index: 2, kind: output, shape index: {}]  }
   0x1   :  { %v11_v0 = vld [vmem:[%s206_s0] sm:$0xff]  ;;  %v118_v1 = vld [vmem:[%s206_s0 + $0x8] sm:$0xff]  ;;  %v119_v2 = vld [vmem:[%s206_s0 + $0x10] sm:$0xff]  ;;  %s141_s19 = smov 1   ;;  %s142_s20 = smov 120   ;;  %132 = vset.pattern.permute.xlu1 %v147_v37  ;;  %134 = vset.pattern.permute.xlu0 %v148_v38 }
   0x2   :  { %v14_v3 = vmax.f32 %v11_v0, %v118_v1  ;;  %v120_v4 = vld [vmem:[%s206_s0 + $0x18] sm:$0xff]  ;;  %s143_s21 = smov 127   ;;  %s144_s22 = smov 7   ;;  %v51_v7 = vld [vmem:[%s207_s1 + $0x40] sm:$0xff]  ;;  %v43_v13 = vld [vmem:[%s207_s1 + $0x30] sm:$0xff] }
   0x3   :  { %v19_v5 = vmax.f32 %v119_v2, %v120_v4  ;;  %s145_s23 = smov 8   ;;  %s146_s24 = smov 9   ;;  %v47_v12 = vld [vmem:[%s207_s1 + $0x38] sm:$0xff]  ;;  %v39_v15 = vld [vmem:[%s207_s1 + $0x28] sm:$0xff]  ;;  %v31_v21 = vld [vmem:[%s207_s1 + $0x10] sm:$0xff] }
   0x4   :  { %v35_v20 = vld [vmem:[%s207_s1 + $0x18] sm:$0xff]  ;;  %v27_v23 = vld [vmem:[%s207_s1 + $0x8] sm:$0xff]  ;;  %v23_v27 = vld [vmem:[%s207_s1] sm:$0xff] }
   0x5   :  { %v20_v6 = vmax.f32 %v14_v3, %v19_v5  ;;  %v53_v31 = vld [vmem:[%s207_s1 + $0x48] sm:$0xff] }
   0x7   :  { %49 = vrot.lane.b32.xlu0 %v20_v6, %s139_s17  ;;  %41 = vrot.lane.b32.xlu1 %v20_v6, %s140_s18 }
   0x8   :  { %33 = vrot.lane.b32.xlu2 %v20_v6, %s141_s19 }
   0xf   :  { %45 = vrot.lane.b32.xlu0 %v20_v6, %s142_s20  ;;  %37 = vrot.lane.b32.xlu1 %v20_v6, %s143_s21 }
  0x10   :  { %29 = vrot.lane.b32.xlu2 %v20_v6, %s144_s22 }
  0x17   :  { %25 = vrot.lane.b32.xlu0 %v20_v6, %s145_s23  ;;  %21 = vrot.lane.b32.xlu1 %v20_v6, %s146_s24 }
  0x62   :  { %v34_v11 = vpop.permute.xlu2 %33 }
  0x63   :  { %v36_v25 = vmul.f32 %v35_v20, %v34_v11 }
  0x6a   :  { %v30_v22 = vpop.permute.xlu2 %29 }
  0x6b   :  { %v32_v26 = vmul.f32 %v31_v21, %v30_v22 }
  0x79   :  { %v50_v8 = vpop.permute.xlu0 %49  ;;  %v42_v9 = vpop.permute.xlu1 %41 }
  0x7a   :  { %v52_v10 = vmul.f32 %v51_v7, %v50_v8  ;;  %v44_v18 = vmul.f32 %v43_v13, %v42_v9 }
  0x7c   :  { %65 = vmatpush.msra.mxu0 %v52_v10 }
  0x81   :  { %v46_v14 = vpop.permute.xlu0 %45  ;;  %v38_v16 = vpop.permute.xlu1 %37 }
  0x82   :  { %v48_v17 = vmul.f32 %v47_v12, %v46_v14  ;;  %v40_v19 = vmul.f32 %v39_v15, %v38_v16 }
  0x84   :  { %66 = vmatpush.msra.mxu0 %v48_v17 }
  0x86   :  { %67 = vmatpush.msra.mxu0 %v44_v18 }
  0x88   :  { %68 = vmatpush.msra.mxu0 %v40_v19 }
  0x89   :  { %v26_v24 = vpop.permute.xlu0 %25  ;;  %v22_v28 = vpop.permute.xlu1 %21 }
  0x8a   :  { %69 = vmatpush.msra.mxu0 %v20_v6  ;;  %v28_v29 = vmul.f32 %v27_v23, %v26_v24  ;;  %v24_v30 = vmul.f32 %v23_v27, %v22_v28 }
  0x8c   :  { %70 = vmatpush.msra.mxu0 %v36_v25 }
  0x8e   :  { %71 = vmatpush.msra.mxu0 %v32_v26 }
  0x90   :  { %72 = vmatpush.msra.mxu0 %v28_v29 }
  0x92   :  { %73 = vmatpush.msra.mxu0 %v24_v30 }
  0x93   :  { %121 = vmatmul.msk.f32.vlgmr.msra.gmra.mxu0 %vm54_vm0, %v53_v31 }
 0x110   :  { %v75_v32 = vpop.f32.mrf.mxu0 }
 0x111   :  { %78 = vadd.xlane.f32.xlu2 %v75_v32 }
 0x184   :  { %v79_v33 = vpop.xlane.xlu2 %78 }
 0x185   :  { %v80_v34 = vmul.f32 0.0078125, %v79_v33 }
 0x187   :  { %v81_v35 = vsub.f32 %v75_v32, %v80_v34 }
 0x189   :  { %v82_v36 = vmul.f32 %v81_v35, %v81_v35 }
 0x18b   :  { %83 = vadd.xlane.f32.xlu0 %v82_v36 }
 0x1fe   :  { %v84_v39 = vpop.xlane.xlu0 %83 }
 0x1ff   :  { %v85_v40 = vmul.f32 0.0078125, %v84_v39 }
 0x201   :  { %v86_v41 = vadd.f32 1e-05, %v85_v40 }
 0x203   :  { %135 = vrsqrt.f32 %v86_v41  ;;  %vm93_vm2 = vweird.f32 %v86_v41 }
 0x209   :  { %v136_v42 = vpop.eup %135 }
 0x20a   :  { %v88_v43 = vmul.f32 %v136_v42, %v86_v41  ;;  %vm94_vm1 = vweird.f32 %v136_v42 }
 0x20b   :  { %vm95_vm3 = vmor %vm93_vm2, %vm94_vm1 }
 0x20c   :  { %v89_v44 = vmul.f32 %v136_v42, %v88_v43 }
 0x20e   :  { %v90_v45 = vmul.f32 0.5, %v89_v44 }
 0x210   :  { %v91_v46 = vsub.f32 1.5, %v90_v45 }
 0x212   :  { %v92_v47 = vmul.f32 %v136_v42, %v91_v46 }
 0x214   :  { %v96_v48 = vsel %vm95_vm3, %v136_v42, %v92_v47 }
 0x215   :  { %v97_v49 = vmul.f32 %v96_v48, %v53_v31 }
 0x217   :  { %100 = vperm.xlu1 %132, %v97_v49  }
 0x21f   :  { %133 = vset.pattern.permute.xlu1 %v148_v38 }
 0x220   :  { %105 = vperm.xlu1 %133, %v53_v31  }
 0x289   :  { %v101_v50 = vpop.permute.xlu1 %100 }
 0x28a   :  { %v103_v51 = vmul.f32 %v101_v50, %v81_v35 }
 0x292   :  { %v106_v52 = vpop.permute.xlu1 %105 }
 0x293   :  { %v108_v53 = vadd.f32 %v106_v52, %v103_v51 }
 0x295   :  { %v109_v54 = vmul.f32 0.5, %v108_v53 }
 0x297   :  { %137 = vtanh.f32 %v109_v54 }
 0x29d   :  { %v138_v55 = vpop.eup %137 }
 0x29e   :  { %v111_v56 = vmul.f32 0.5, %v138_v55 }
 0x2a0   :  { %v112_v57 = vadd.f32 0.5, %v111_v56 }
 0x2a2   :  { %113 = vst [vmem:[%s208_s2] sm:$0xff] %v112_v57 }

</bundles_post_ra>
